<compile_context>
chip_gen: v5e
topology: v5e:2x2
jax: 0.10.0
libtpu: 0.0.40
codegen_flags: <defaults>
</compile_context>

<pallas_src>
import functools

import jax
import jax.numpy as jnp
from jax.experimental import pallas as pl
from jax.experimental.pallas import tpu as pltpu


def _round_up(x, m):
    return ((x + m - 1) // m) * m


_FULLK_TILE_BYTES_BUDGET = 24 * 2**20   # keeps the 2x-headroom limit <= 48 MiB (v7x-safe)


def _pick_block(dim_pad, candidates, max_waste=0.25):
    """Largest candidate tile whose round-up padding waste on dim_pad is <= max_waste."""
    for t in candidates:
        if _round_up(dim_pad, t) <= dim_pad * (1.0 + max_waste):
            return t
    return candidates[-1]


# ----------------------------- Pallas kernels --------------------------------
def _mm_fullk_kernel(p_ref, w_ref, scale_ref, bias_ref, o_ref, *, apply_relu):
    # p_ref:     (tm, K_pad) bf16 im2col patch tile (full reduction dim)
    # w_ref:     (K_pad, tn) bf16 conv weight tile (un-scaled)
    # scale_ref: (1,  tn)    f32 folded BN scale  (gamma / sqrt(var + eps))
    # bias_ref:  (1,  tn)    f32 folded BN bias   (beta - mean * scale)
    # o_ref:     (tm, tn)    bf16 output tile
    acc = jnp.dot(p_ref[...], w_ref[...], preferred_element_type=jnp.float32)
    y = acc * scale_ref[...] + bias_ref[...]
    if apply_relu:
        y = jnp.maximum(y, 0.0)
    o_ref[...] = y.astype(o_ref.dtype)


def _mm_ktiled_kernel(p_ref, w_ref, scale_ref, bias_ref, o_ref, acc_ref, *, apply_relu):
    # Fallback when K is too large for a VMEM-resident full-K tile.
    k = pl.program_id(2)

    @pl.when(k == 0)
    def _():
        acc_ref[...] = jnp.zeros_like(acc_ref)

    acc_ref[...] += jnp.dot(p_ref[...], w_ref[...],
                            preferred_element_type=jnp.float32)

    @pl.when(k == pl.num_programs(2) - 1)
    def _():
        y = acc_ref[...] * scale_ref[...] + bias_ref[...]
        if apply_relu:
            y = jnp.maximum(y, 0.0)
        o_ref[...] = y.astype(o_ref.dtype)


# --------------------------- fused matmul wrapper -----------------------------
def _fused_matmul_bn_act(patches, w2d, scale, bias, *, apply_relu,
                         out_dtype=jnp.bfloat16):
    """((M,K) @ (K,O)) * scale[O] + bias[O]  (+ ReLU), f32 accumulation on MXU."""
    M, K = patches.shape
    K2, O = w2d.shape
    assert K == K2
    out_bytes = jnp.dtype(out_dtype).itemsize

    M_pad = _round_up(M, 128)
    K_pad = _round_up(K, 128)          # reduction axis padded to 128 only
    O_pad = _round_up(O, 128)

    tn = _pick_block(O_pad, (512, 256, 128))
    tm = _pick_block(M_pad, (1024, 512, 256, 128))

    def fullk_bytes(tm_, tn_):
        return (2 * tm_ * K_pad * 2          # patch tile, bf16, double-buffered
                + 2 * K_pad * tn_ * 2        # weight tile, bf16, double-buffered
                + 2 * tm_ * tn_ * out_bytes  # output tile, double-buffered
                + 4 * tn_ * 4)               # scale + bias blocks

    # Prefer the full-K formulation; shrink tiles while it does not fit VMEM.
    use_full_k = True
    while fullk_bytes(tm, tn) > _FULLK_TILE_BYTES_BUDGET:
        if tm > 256:
            tm //= 2
        elif tn > 128:
            tn //= 2
        else:
            use_full_k = False
            break

    M_pad = _round_up(M_pad, tm)
    O_pad = _round_up(O_pad, tn)

    # v7x has 2 TensorCores sharded over the parallel axes: never leave a
    # 1x1 parallel grid if M can be split (negligible cost on 1-TC v5e/v6e).
    if use_full_k and (M_pad // tm) * (O_pad // tn) == 1 and tm % 256 == 0:
        tm //= 2

    # ---- pad + cast streamed operands (zero columns contribute nothing) ----
    p_p = jnp.pad(patches.astype(jnp.bfloat16), ((0, M_pad - M), (0, K_pad - K)))
    w_p = jnp.pad(w2d.astype(jnp.bfloat16), ((0, K_pad - K), (0, O_pad - O)))
    s_p = jnp.pad(scale.reshape(1, -1).astype(jnp.float32), ((0, 0), (0, O_pad - O)))
    b_p = jnp.pad(bias.reshape(1, -1).astype(jnp.float32), ((0, 0), (0, O_pad - O)))

    if use_full_k:
        grid = (M_pad // tm, O_pad // tn)
        tile_bytes = fullk_bytes(tm, tn)
        vmem_limit = int(min(48 * 2**20, max(16 * 2**20, 2 * tile_bytes)))
        cost = pl.CostEstimate(
            flops=2 * M_pad * K_pad * O_pad,
            transcendentals=0,
            bytes_accessed=(M_pad * K_pad * 2                     # patches read once
                            + K_pad * O_pad * 2 * (M_pad // tm)   # weight per M-block
                            + M_pad * O_pad * out_bytes),         # output write
        )
        kernel = functools.partial(_mm_fullk_kernel, apply_relu=bool(apply_relu))
        out = pl.pallas_call(
            kernel,
            out_shape=jax.ShapeDtypeStruct((M_pad, O_pad), out_dtype),
            grid_spec=pltpu.PrefetchScalarGridSpec(
                num_scalar_prefetch=0,
                grid=grid,
                in_specs=[
                    pl.BlockSpec((tm, K_pad), lambda i, j: (i, 0)),  # patches (resident over j)
                    pl.BlockSpec((K_pad, tn), lambda i, j: (0, j)),  # weights
                    pl.BlockSpec((1, tn), lambda i, j: (0, j)),      # BN scale
                    pl.BlockSpec((1, tn), lambda i, j: (0, j)),      # BN bias
                ],
                out_specs=pl.BlockSpec((tm, tn), lambda i, j: (i, j)),
            ),
            compiler_params=pltpu.CompilerParams(
                dimension_semantics=("parallel", "parallel"),
                vmem_limit_bytes=vmem_limit,
            ),
            cost_estimate=cost,
        )(p_p, w_p, s_p, b_p)
        return out[:M, :O]

    # ---- K-tiled fallback (very large C*kh*kw only) ----
    tk = 2048
    while K_pad % tk != 0:
        tk //= 2
    grid = (M_pad // tm, O_pad // tn, K_pad // tk)
    tile_bytes = (2 * tm * tk * 2 + 2 * tk * tn * 2
                  + 2 * tm * tn * out_bytes + tm * tn * 4 + 4 * tn * 4)
    vmem_limit = int(min(48 * 2**20, max(16 * 2**20, 2 * tile_bytes)))
    cost = pl.CostEstimate(
        flops=2 * M_pad * K_pad * O_pad,
        transcendentals=0,
        bytes_accessed=(M_pad * K_pad * 2 * (O_pad // tn)
                        + K_pad * O_pad * 2 * (M_pad // tm)
                        + M_pad * O_pad * out_bytes),
    )
    kernel = functools.partial(_mm_ktiled_kernel, apply_relu=bool(apply_relu))
    out = pl.pallas_call(
        kernel,
        out_shape=jax.ShapeDtypeStruct((M_pad, O_pad), out_dtype),
        grid_spec=pltpu.PrefetchScalarGridSpec(
            num_scalar_prefetch=0,
            grid=grid,
            in_specs=[
                pl.BlockSpec((tm, tk), lambda i, j, k: (i, k)),
                pl.BlockSpec((tk, tn), lambda i, j, k: (k, j)),
                pl.BlockSpec((1, tn), lambda i, j, k: (0, j)),
                pl.BlockSpec((1, tn), lambda i, j, k: (0, j)),
            ],
            out_specs=pl.BlockSpec((tm, tn), lambda i, j, k: (i, j)),
            scratch_shapes=[pltpu.VMEM((tm, tn), jnp.float32)],
        ),
        compiler_params=pltpu.CompilerParams(
            dimension_semantics=("parallel", "parallel", "arbitrary"),
            vmem_limit_bytes=vmem_limit,
        ),
        cost_estimate=cost,
    )(p_p, w_p, s_p, b_p)
    return out[:M, :O]


# ------------------------------ BasicConv ------------------------------------
class BasicConvPallas:
    """Mirror of the PyTorch BasicConv module (conv -> bn(eval) -> relu)."""

    def __init__(self, in_planes, out_planes, kernel_size, stride=1, padding=0,
                 dilation=1, groups=1, relu=True, bn=True, bias=False, *,
                 key, out_dtype=jnp.bfloat16):
        assert groups == 1 and dilation == 1, "demo supports groups=1, dilation=1"
        assert not bias, "BasicConv default uses bias=False"
        self.in_planes = in_planes
        self.out_planes = out_planes
        self.k = kernel_size
        self.stride = stride
        self.padding = padding
        self.use_bn = bn
        self.use_relu = relu
        self.out_dtype = out_dtype

        kw, kg, _ = jax.random.split(key, 3)
        # Conv weight [O, C, kh, kw] -- deterministic init, kept in f32.
        self.weight = 0.1 * jax.random.normal(
            kw, (out_planes, in_planes, kernel_size, kernel_size), jnp.float32)
        # BatchNorm2d(affine=True) parameters + (non-trivial) running stats.
        self.gamma = 1.0 + 0.05 * jax.random.normal(kg, (out_planes,), jnp.float32)
        self.beta = 0.01 * jnp.arange(out_planes, dtype=jnp.float32)
        self.running_mean = 0.01 * jnp.arange(out_planes, dtype=jnp.float32)
        self.running_var = 1.0 + 0.02 * jnp.arange(out_planes, dtype=jnp.float32)
        self.eps = 1e-5

    def _im2col(self, x):
        # x: [N, C, H, W]  ->  patches [N*H_out*W_out, C*kh*kw], C-major.
        N, C, H, W = x.shape
        k, s, p = self.k, self.stride, self.padding
        H_out = (H + 2 * p - k) // s + 1
        W_out = (W + 2 * p - k) // s + 1
        xp = jnp.pad(x, ((0, 0), (0, 0), (p, p), (p, p)))
        cols = []
        for ki in range(k):
            for kj in range(k):
                cols.append(xp[:, :, ki:ki + s * H_out:s, kj:kj + s * W_out:s])
        # [k*k, N, C, H_out, W_out] -> [N, H_out, W_out, C, k*k]
        pat = jnp.stack(cols, axis=0).transpose(1, 3, 4, 2, 0)
        return pat.reshape(N * H_out * W_out, C * k * k), (N, H_out, W_out)

    def __call__(self, x):
        # bf16 end-to-end glue: the kh*kw-amplified patches land in HBM as bf16.
        x = x.astype(jnp.bfloat16)
        patches, (N, H_out, W_out) = self._im2col(x)

        # Weight [O, C, kh, kw] -> [C*kh*kw, O]  (matches patch column order).
        w2d = self.weight.reshape(self.out_planes, -1).T

        if self.use_bn:
            scale = self.gamma / jnp.sqrt(self.running_var + self.eps)
            bias = self.beta - self.running_mean * scale
        else:
            scale = jnp.ones((self.out_planes,), jnp.float32)
            bias = jnp.zeros((self.out_planes,), jnp.float32)

        out2d = _fused_matmul_bn_act(
            patches, w2d, scale, bias,
            apply_relu=self.use_relu, out_dtype=self.out_dtype)

        # [M, O] -> [N, H_out, W_out, O] -> NCHW [N, O, H_out, W_out]
        out = out2d.reshape(N, H_out, W_out, self.out_planes)
        return out.transpose(0, 3, 1, 2)


# ------------------------------- reference -----------------------------------
def _reference(mod, x):
    conv = jax.lax.conv_general_dilated(
        x, mod.weight, window_strides=(mod.stride, mod.stride),
        padding=[(mod.padding, mod.padding)] * 2,
        dimension_numbers=("NCHW", "OIHW", "NCHW"))
    y = conv
    if mod.use_bn:
        scale = mod.gamma / jnp.sqrt(mod.running_var + mod.eps)
        bias = mod.beta - mod.running_mean * scale
        y = y * scale[None, :, None, None] + bias[None, :, None, None]
    if mod.use_relu:
        y = jnp.maximum(y, 0.0)
    return y


# ------------------------------- main ----------------------------------------
if __name__ == "__main__":
    key = jax.random.PRNGKey(0)
    kx, kp1, kp2 = jax.random.split(key, 3)

    # Small shapes consistent with the module: x NCHW = [2, 4, 16, 16]
    N, C, H, W = 2, 4, 16, 16
    O, K, S, P = 8, 3, 1, 1
    x = jax.random.normal(kx, (N, C, H, W), jnp.float32)

    # relu=True (default BasicConv)
    mod = BasicConvPallas(C, O, kernel_size=K, stride=S, padding=P,
                          relu=True, bn=True, bias=False, key=kp1)
    out = jax.block_until_ready(mod(x))
    ref = _reference(mod, x)
    assert out.shape == (N, O, H, W)
    # bf16 streamed operands + bf16 output -> loosened tolerance vs f32 XLA ref.
    assert jnp.allclose(out.astype(jnp.float32), ref, atol=2e-2, rtol=2e-2)

    # relu=False variant.
    mod_nr = BasicConvPallas(C, O, kernel_size=K, stride=S, padding=P,
                             relu=False, bn=True, bias=False, key=kp2)
    out_nr = jax.block_until_ready(mod_nr(x))
    ref_nr = _reference(mod_nr, x)
    assert out_nr.shape == (N, O, H, W)
    assert jnp.allclose(out_nr.astype(jnp.float32), ref_nr, atol=2e-2, rtol=2e-2)

    print("KERNEL_OK")
</pallas_src>

<mosaic_0001>
module attributes {stable_mosaic.version = 11 : i64} {
  func.func @_mm_fullk_kernel(%arg0: i32, %arg1: i32, %arg2: memref<256x128xbf16, #tpu.memory_space<vmem>>, %arg3: memref<128x128xbf16, #tpu.memory_space<vmem>>, %arg4: memref<1x128xf32, #tpu.memory_space<vmem>>, %arg5: memref<1x128xf32, #tpu.memory_space<vmem>>, %arg6: memref<256x128xbf16, #tpu.memory_space<vmem>>) attributes {dimension_semantics = [#tpu.dimension_semantics<parallel>, #tpu.dimension_semantics<parallel>], iteration_bounds = array<i64: 2, 1>, scalar_prefetch = 0 : i64, scratch_operands = 0 : i64, tpu.core_type = #tpu.core_type<tc>, window_params = [{transform_indices = @transform_0, window_bounds = array<i64: 256, 128>}, {transform_indices = @transform_1, window_bounds = array<i64: 128, 128>}, {transform_indices = @transform_2, window_bounds = array<i64: 1, 128>}, {transform_indices = @transform_3, window_bounds = array<i64: 1, 128>}, {transform_indices = @transform_4, window_bounds = array<i64: 256, 128>}]} {
    %c0 = arith.constant 0 : index
    %c0_0 = arith.constant 0 : index
    %0 = vector.load %arg2[%c0, %c0_0] : memref<256x128xbf16, #tpu.memory_space<vmem>>, vector<256x128xbf16>
    %c0_1 = arith.constant 0 : index
    %c0_2 = arith.constant 0 : index
    %1 = vector.load %arg3[%c0_1, %c0_2] : memref<128x128xbf16, #tpu.memory_space<vmem>>, vector<128x128xbf16>
    %cst = arith.constant dense<0.000000e+00> : vector<256x128xf32>
    %2 = tpu.matmul %0, %1, %cst {dimension_numbers = #tpu.dot_dimension_numbers<[1], [0], [0], [1], [0, 0, 1, 1], [], []>} : vector<256x128xbf16>, vector<128x128xbf16>, vector<256x128xf32> -> vector<256x128xf32>
    %c0_3 = arith.constant 0 : index
    %c0_4 = arith.constant 0 : index
    %3 = vector.load %arg4[%c0_3, %c0_4] : memref<1x128xf32, #tpu.memory_space<vmem>>, vector<1x128xf32>
    %4 = vector.broadcast %3 : vector<1x128xf32> to vector<256x128xf32>
    %5 = arith.mulf %2, %4 : vector<256x128xf32>
    %c0_5 = arith.constant 0 : index
    %c0_6 = arith.constant 0 : index
    %6 = vector.load %arg5[%c0_5, %c0_6] : memref<1x128xf32, #tpu.memory_space<vmem>>, vector<1x128xf32>
    %7 = vector.broadcast %6 : vector<1x128xf32> to vector<256x128xf32>
    %8 = arith.addf %5, %7 : vector<256x128xf32>
    %cst_7 = arith.constant 0.000000e+00 : f32
    %9 = vector.broadcast %cst_7 : f32 to vector<256x128xf32>
    %10 = arith.maximumf %8, %9 : vector<256x128xf32>
    %11 = arith.truncf %10 : vector<256x128xf32> to vector<256x128xbf16>
    %c0_8 = arith.constant 0 : index
    %c0_9 = arith.constant 0 : index
    %12 = vector.load %arg6[%c0_8, %c0_9] : memref<256x128xbf16, #tpu.memory_space<vmem>>, vector<256x128xbf16>
    tpu.vector_store %arg6[%c0_8, %c0_9], %11 {strides = array<i32>} : memref<256x128xbf16, #tpu.memory_space<vmem>>, vector<256x128xbf16>,
    return
  }
  func.func @transform_0(%arg0: i32, %arg1: i32) -> (i32, i32) {
    %c0_i32 = arith.constant 0 : i32
    %c0_i32_0 = arith.constant 0 : i32
    return %arg0, %c0_i32 : i32, i32
  }
  func.func @transform_1(%arg0: i32, %arg1: i32) -> (i32, i32) {
    %c0_i32 = arith.constant 0 : i32
    %c0_i32_0 = arith.constant 0 : i32
    return %c0_i32, %arg1 : i32, i32
  }
  func.func @transform_2(%arg0: i32, %arg1: i32) -> (i32, i32) {
    %c0_i32 = arith.constant 0 : i32
    %c0_i32_0 = arith.constant 0 : i32
    return %c0_i32, %arg1 : i32, i32
  }
  func.func @transform_3(%arg0: i32, %arg1: i32) -> (i32, i32) {
    %c0_i32 = arith.constant 0 : i32
    %c0_i32_0 = arith.constant 0 : i32
    return %c0_i32, %arg1 : i32, i32
  }
  func.func @transform_4(%arg0: i32, %arg1: i32) -> (i32, i32) {
    %c0_i32 = arith.constant 0 : i32
    return %arg0, %arg1 : i32, i32
  }
}

</mosaic_0001>

<bundles_post_ra>
// kernel: tpu_custom_call.1
= control target key start
LH: loop header
LB: loop body
LE: loop exit
PB: predicated region body
PF: predicated region fallthrough
CT: control target
= control target key end

     0   :  { %s1658_s0 = inlined_call_operand.hbm [shape: bf16[512,128], index: 0, kind: input, shape index: {}]   ;;  %s1659_s1 = inlined_call_operand.hbm [shape: bf16[128,128], index: 1, kind: input, shape index: {}]   ;;  %s1660_s2 = inlined_call_operand.vmem [shape: f32[1,128], index: 2, kind: input, shape index: {}]   ;;  %s1661_s3 = inlined_call_operand.vmem [shape: f32[1,128], index: 3, kind: input, shape index: {}]   ;;  %s1662_s4 = inlined_call_operand.hbm [shape: bf16[512,128], index: 4, kind: output, shape index: {}]  }
   0x1   :  { %1666 = sst [smem:[#allocation12_spill]] %s1659_s1 }
   0x2   :  { %9 = vsyncpa [#allocation3], 0 }
   0x3   :  { %11 = vsyncpa [#allocation3 + $0x1], 0 }
   0x4   :  { %12 = vsyncpa [#allocation6], 0 }
   0x5   :  { %13 = vsyncpa [#allocation4], 0 }
   0x6   :  { %15 = vsyncpa [#allocation4 + $0x1], 0  ;;  %s1388_s15 = smov 0   ;;  %s1390_s16 = smov 0  }
   0x7   :  { %s1392_s17 = smov 0   ;;  %s1394_s18 = smov 0  }
   0x8   :  { %s1396_s19 = smov 0   ;;  %s1398_s20 = smov 0  }
   0x9 LB: > { %s871_s21 = sadd.s32 4294967295, %s1356_s20   ;;  %s872_s22 = sadd.s32 4294967294, %s1356_s20   ;;  %s1356_s20 = sphi %s1398_s20, %s21_s20   ;;  %s1352_s19 = sphi %s1396_s19, %s1683_s19   ;;  %s1348_s18 = sphi %s1394_s18, %s1682_s18   ;;  %s1344_s17 = sphi %s1392_s17, %s1681_s17   ;;  %s1340_s16 = sphi %s1390_s16, %s1680_s16   ;;  %s1336_s15 = sphi %s1388_s15, %s1679_s15  }
   0xa   : > { %p53_p0 = scmp.ne.s32.totalorder %s1340_s16, %s1336_s15  ;;  %p1422_p1 = scmp.eq.s32.totalorder %s871_s21, 0 }
   0xb   : > { %p1426_p2 = scmp.eq.s32.totalorder %s871_s21, 1  ;;  %p163_p3 = scmp.eq.s32.totalorder %s872_s22, 1 }
   0xc   : > { %p1432_p4 = por %p1422_p1, %p53_p0  ;;  %p873_p5 = scmp.ge.s32.totalorder %s1356_s20, 1 }
   0xd   : > { %p1437_p6 = por %p163_p3, %p53_p0  ;;  %p170_p7 = scmp.lt.s32.totalorder %s1356_s20, 3 }
   0xe   : > { %s1671_s1 = sld [smem:[#allocation12_spill]]  ;;  %s1358_s5 = smov [#allocation5]  }
   0xf   : > { %p1445_p8 = pnand %p873_p5, %p170_p7  ;;  %s185_s6 = sshll.u32 %s1358_s5, 4  ;;  %s186_s6 = int_to_ptr.vmem [resolvable:$true] %s185_s6 }
  0x10   : > { %p877_p11 = scmp.ge.s32.totalorder %s1356_s20, 2  ;;  %s1663_s7 = smov 64  }
  0x11   : > { %p1139_p9 = pneg %p1445_p8  ;;  %s1664_s8 = smov 4  }
  0x12   : > { %s33_s9 = sadd.s32 1, %s1352_s19  ;;  %s40_s10 = sadd.s32 1, %s1344_s17 }
  0x13   : > { %p1140_p10 = pnand %p1139_p9, %p1422_p1  ;;  %p35_p12 = scmp.ge.s32.totalorder %s33_s9, 2 }
  0x14   : > { %s183_s29 = sshll.u32 %s1671_s1, 4  ;;  %p47_p13 = scmp.ne.s32.totalorder %s1344_s17, %s1340_s16  ;;  %s184_s29 = int_to_ptr.hbm [resolvable:$true] %s183_s29 }
  0x15   : > { %1142 = dma.hbm_to_vmem [thread:$0]  (!%p1140_p10), %s184_s29, 1024, %s186_s6, [#allocation6], %s1663_s7, %s1663_s7, %s1664_s8  }
  0x16   : > { %p48_p0 = scmp.eq.s32.totalorder %s1356_s20, 0  ;;  %s1685_s9 = smov (%p35_p12, %s33_s9), 0 }
  0x17   : > { %1673 = sst [smem:[#allocation11_spill]] %s1685_s9  ;;  %p1470_p5 = por %p1426_p2, %p47_p13 }
  0x18   : > { %p1464_p3 = por %p48_p0, %p47_p13  ;;  %s37_s13 = ssub.s32 %s1352_s19, %s1685_s9 }
  0x19   : > { %p1152_p7 = scmp.lt.s32.totalorder %s1356_s20, 2  ;;  %p38_p9 = scmp.eq.s32.totalorder %s37_s13, 0 }
  0x1a   : > { %s211_s14 = sand.u32 1, %s1344_s17   ;;  %s986_s27 = sshll.u32 %s1352_s19, 7 }
  0x1b   : > { %s878_s21 = sshll.u32 %s211_s14, 7  ;;  %s220_s5 = scalar_lea.hbm %s1658_s0, %s986_s27 }
  0x1c   : > { %s1479_s22 = scalar_select %p38_p9, %s1344_s17, %s40_s10  }
  0x1d   : > { %s215_s6 = scalar_lea.vmem [#allocation2], %s878_s21  ;;  %s221_s24 = sshll.u32 %s220_s5, 4  ;;  %s222_s24 = int_to_ptr.hbm [resolvable:$true] %s221_s24 }
  0x1e   : > { %s223_s7 = sshll.u32 %s215_s6, 4  ;;  %p1144_p2 = pnand %p1152_p7, %p1464_p3  ;;  %s224_s7 = int_to_ptr.vmem [resolvable:$true] %s223_s7 }
  0x1f   : > { %s212_s8 = scalar_lea.sflag [#allocation3], %s211_s14  ;;  %s1676_s1 = smov 4  }
  0x20   : > { %s1677_s9 = smov 64   ;;  %235 = sbr.rel (%p1445_p8) target bundleno = 274 (0x112), region = 36 }
  0x21   : > { %1146 = dma.hbm_to_vmem [thread:$0]  (!%p1144_p2), %s222_s24, 2048, %s224_s7, %s212_s8, %s1677_s9, %s1677_s9, %s1676_s1  }
  0x22   : > { %s1493_s10 = sand.u32 (!%p1445_p8), 1, %s1340_s16  }
  0x23   : > { %s882_s13 = sshll.u32 (!%p1445_p8), %s1493_s10, 7  ;;  %s238_s21 = scalar_lea.sflag (!%p1445_p8), [#allocation3], %s1493_s10 }
  0x24   : > { %s1499_s11 = scalar_lea.vmem (!%p1445_p8), [#allocation2], %s882_s13 }
  0x25   : > { %1323 = dma.done.wait (%p1432_p4), %s238_s21, 2048  }
  0x26   : > { %1325 = vsyncadd (%p1432_p4), %s238_s21, 4294965248 }
  0x27   : > { %1327 = dma.done.wait (%p1422_p1), [#allocation6], 1024  }
  0x28   : > { %1329 = vsyncadd (%p1422_p1), [#allocation6], 4294966272  ;;  %v1010_v0 = vld [vmem:[#allocation5 + $0x38] sm:$0xff]  ;;  %v1009_v1 = vld [vmem:[#allocation5 + $0x30] sm:$0xff]  ;;  %s1551_s7 = scalar_lea.vmem [#allocation7], %s882_s13  ;;  %s1011_s8 = sshll.u32 %s1348_s18, 7 }
  0x29   : > { %478 = vmatpush.bf16.msra.mxu0 %v1010_v0  ;;  %1107 = vmatpush.bf16.msra.mxu1 %v1010_v0  ;;  %v1008_v2 = vld [vmem:[#allocation5 + $0x28] sm:$0xff]  ;;  %v1007_v3 = vld [vmem:[#allocation5 + $0x20] sm:$0xff]  ;;  %v1006_v4 = vld [vmem:[#allocation5 + $0x18] sm:$0xff]  ;;  %s748_s27 = scalar_lea.hbm %s1662_s4, %s1011_s8  ;;  %s749_s18 = sshll.u32 %s1551_s7, 4  ;;  %s750_s18 = int_to_ptr.vmem [resolvable:$true] %s749_s18 }
  0x2a   : > { %1108 = vmatpush.bf16.msra.mxu2 %v1010_v0  ;;  %1109 = vmatpush.bf16.msra.mxu3 %v1010_v0  ;;  %v1005_v5 = vld [vmem:[#allocation5 + $0x10] sm:$0xff]  ;;  %v1004_v6 = vld [vmem:[#allocation5 + $0x8] sm:$0xff]  ;;  %v1003_v7 = vld [vmem:[#allocation5] sm:$0xff]  ;;  %s751_s28 = sshll.u32 %s748_s27, 4  ;;  %s736_s29 = scalar_lea.sflag [#allocation4], %s1493_s10  ;;  %s752_s28 = int_to_ptr.hbm [resolvable:$true] %s751_s28 }
  0x2b   : > { %v987_v8 = vld [vmem:[%s1499_s11] sm:$0xff]  ;;  %v988_v12 = vld [vmem:[%s1499_s11 + $0x8] sm:$0xff]  ;;  %v989_v16 = vld [vmem:[%s1499_s11 + $0x10] sm:$0xff]  ;;  %s1284_s5 = sshra.s32 %s752_s28, 4  ;;  %s1290_s21 = scalar_lea.hbm %s1662_s4, 256  ;;  %s1285_s5 = int_to_ptr.hbm [resolvable:$true] %s1284_s5 }
  0x2c   : > { %v991_v9 = vld [vmem:[%s1499_s11 + $0x20] sm:$0xff]  ;;  %v992_v13 = vld [vmem:[%s1499_s11 + $0x28] sm:$0xff]  ;;  %v993_v17 = vld [vmem:[%s1499_s11 + $0x30] sm:$0xff]  ;;  %s1286_s6 = scalar_lea.hbm %s1285_s5, 128  ;;  %p1291_p10 = scmp.lt.s32.totalorder %s1285_s5, %s1662_s4 }
  0x2d   : > { %479 = vmatpush.bf16.msra.mxu0 %v1009_v1  ;;  %1110 = vmatpush.bf16.msra.mxu1 %v1009_v1  ;;  %v995_v10 = vld [vmem:[%s1499_s11 + $0x40] sm:$0xff]  ;;  %v996_v14 = vld [vmem:[%s1499_s11 + $0x48] sm:$0xff]  ;;  %v997_v18 = vld [vmem:[%s1499_s11 + $0x50] sm:$0xff]  ;;  %p1287_p1 = scmp.ne.s32.totalorder %s1285_s5, %s1286_s6  ;;  %p1292_p12 = scmp.lt.s32.totalorder %s1290_s21, %s1286_s6 }
  0x2e   : > { %1111 = vmatpush.bf16.msra.mxu2 %v1009_v1  ;;  %1112 = vmatpush.bf16.msra.mxu3 %v1009_v1  ;;  %v999_v11 = vld [vmem:[%s1499_s11 + $0x60] sm:$0xff]  ;;  %v1000_v15 = vld [vmem:[%s1499_s11 + $0x68] sm:$0xff]  ;;  %v1001_v19 = vld [vmem:[%s1499_s11 + $0x70] sm:$0xff] }
  0x2f   : > { %v990_v20 = vld [vmem:[%s1499_s11 + $0x18] sm:$0xff]  ;;  %v1528_v26 = vld [vmem:[%s1660_s2] ss:$0 sm:$0xff]  ;;  %p1288_p4 = pnand %p1287_p1, %p1470_p5  ;;  %p1293_p13 = por %p1292_p12, %p1291_p10 }
  0x30   : > { %v994_v21 = vld [vmem:[%s1499_s11 + $0x38] sm:$0xff]  ;;  %v1534_v28 = vld [vmem:[%s1661_s3] ss:$0 sm:$0xff] }
  0x31   : > { %480 = vmatpush.bf16.msra.mxu0 %v1008_v2  ;;  %1113 = vmatpush.bf16.msra.mxu1 %v1008_v2  ;;  %v998_v22 = vld [vmem:[%s1499_s11 + $0x58] sm:$0xff]  ;;  %p1289_p8 = pneg %p1288_p4 }
  0x32   : > { %1114 = vmatpush.bf16.msra.mxu2 %v1008_v2  ;;  %1115 = vmatpush.bf16.msra.mxu3 %v1008_v2  ;;  %v1002_v23 = vld [vmem:[%s1499_s11 + $0x78] sm:$0xff] }
  0x33   : > { %p1294_p0 = pnand %p1293_p13, %p1289_p8 }
  0x35   : > { %481 = vmatpush.bf16.msra.mxu0 %v1007_v3  ;;  %1116 = vmatpush.bf16.msra.mxu1 %v1007_v3 }
  0x36   : > { %1117 = vmatpush.bf16.msra.mxu2 %v1007_v3  ;;  %1118 = vmatpush.bf16.msra.mxu3 %v1007_v3 }
  0x39   : > { %482 = vmatpush.bf16.msra.mxu0 %v1006_v4  ;;  %1119 = vmatpush.bf16.msra.mxu1 %v1006_v4 }
  0x3a   : > { %1120 = vmatpush.bf16.msra.mxu2 %v1006_v4  ;;  %1121 = vmatpush.bf16.msra.mxu3 %v1006_v4 }
  0x3d   : > { %483 = vmatpush.bf16.msra.mxu0 %v1005_v5  ;;  %1122 = vmatpush.bf16.msra.mxu1 %v1005_v5 }
  0x3e   : > { %1123 = vmatpush.bf16.msra.mxu2 %v1005_v5  ;;  %1124 = vmatpush.bf16.msra.mxu3 %v1005_v5 }
  0x41   : > { %484 = vmatpush.bf16.msra.mxu0 %v1004_v6  ;;  %1125 = vmatpush.bf16.msra.mxu1 %v1004_v6 }
  0x42   : > { %1126 = vmatpush.bf16.msra.mxu2 %v1004_v6  ;;  %1127 = vmatpush.bf16.msra.mxu3 %v1004_v6 }
  0x45   : > { %485 = vmatpush.bf16.msra.mxu0 %v1003_v7  ;;  %1128 = vmatpush.bf16.msra.mxu1 %v1003_v7 }
  0x46   : > { %1129 = vmatpush.bf16.msra.mxu2 %v1003_v7  ;;  %1130 = vmatpush.bf16.msra.mxu3 %v1003_v7 }
  0x48   : > { %486 = vmatmul.bf16.vlgmr.msra.gmra.mxu0 %v987_v8  ;;  %506 = vmatmul.bf16.vlgmr.msra.gmra.mxu1 %v991_v9 }
  0x49   : > { %526 = vmatmul.bf16.vlgmr.msra.gmra.mxu2 %v995_v10  ;;  %546 = vmatmul.bf16.vlgmr.msra.gmra.mxu3 %v999_v11 }
  0x58   : > { %491 = vmatmul.bf16.gmra.mxu0 %v988_v12  ;;  %511 = vmatmul.bf16.gmra.mxu1 %v992_v13 }
  0x59   : > { %531 = vmatmul.bf16.gmra.mxu2 %v996_v14  ;;  %551 = vmatmul.bf16.gmra.mxu3 %v1000_v15 }
  0x68   : > { %496 = vmatmul.bf16.gmra.mxu0 %v989_v16  ;;  %516 = vmatmul.bf16.gmra.mxu1 %v993_v17 }
  0x69   : > { %536 = vmatmul.bf16.gmra.mxu2 %v997_v18  ;;  %556 = vmatmul.bf16.gmra.mxu3 %v1001_v19 }
  0x78   : > { %501 = vmatmul.bf16.gmra.mxu0 %v990_v20  ;;  %521 = vmatmul.bf16.gmra.mxu1 %v994_v21 }
  0x79   : > { %541 = vmatmul.bf16.gmra.mxu2 %v998_v22  ;;  %561 = vmatmul.bf16.gmra.mxu3 %v1002_v23 }
  0xc5   : > { %v487_v24 = vpop.f32.mrf.mxu0  ;;  %v507_v25 = vpop.f32.mrf.mxu1 }
  0xc6   : > { %v571_v27 = vmul.f32 %v1528_v26, %v487_v24  ;;  %v579_v29 = vmul.f32 %v1528_v26, %v507_v25 }
  0xc8   : > { %v607_v34 = vadd.f32 %v1534_v28, %v571_v27  ;;  %v615_v35 = vadd.f32 %v1534_v28, %v579_v29 }
  0xca   : > { %v639_v42 = vmax.f32 %v607_v34, 0.0  ;;  %v647_v43 = vmax.f32 %v615_v35, 0.0 }
  0xcc   : > { %v527_v30 = vpop.f32.mrf.mxu2  ;;  %v547_v31 = vpop.f32.mrf.mxu3 }
  0xcd   : > { %v489_v32 = vpop.f32.mrf.mxu0  ;;  %v509_v33 = vpop.f32.mrf.mxu1  ;;  %v587_v40 = vmul.f32 %v1528_v26, %v527_v30  ;;  %v595_v41 = vmul.f32 %v1528_v26, %v547_v31 }
  0xce   : > { %v572_v36 = vmul.f32 %v1528_v26, %v489_v32  ;;  %v580_v37 = vmul.f32 %v1528_v26, %v509_v33 }
  0xcf   : > { %v623_v50 = vadd.f32 %v1534_v28, %v587_v40  ;;  %v631_v51 = vadd.f32 %v1534_v28, %v595_v41 }
  0xd0   : > { %v608_v38 = vadd.f32 %v1534_v28, %v572_v36  ;;  %v616_v39 = vadd.f32 %v1534_v28, %v580_v37 }
  0xd1   : > { %v655_v58 = vmax.f32 %v623_v50, 0.0  ;;  %v663_v59 = vmax.f32 %v631_v51, 0.0 }
  0xd2   : > { %v640_v44 = vmax.f32 %v608_v38, 0.0  ;;  %v648_v45 = vmax.f32 %v616_v39, 0.0 }
  0xd4   : > { %v1015_v46 = vpack.c.bf16 %v640_v44, %v639_v42  ;;  %v1035_v47 = vpack.c.bf16 %v648_v45, %v647_v43  ;;  %v529_v48 = vpop.f32.mrf.mxu2  ;;  %v549_v49 = vpop.f32.mrf.mxu3 }
  0xd5   : > { %v588_v52 = vmul.f32 %v1528_v26, %v529_v48  ;;  %v596_v53 = vmul.f32 %v1528_v26, %v549_v49  ;;  %v492_v54 = vpop.f32.mrf.mxu0  ;;  %v512_v55 = vpop.f32.mrf.mxu1 }
  0xd6   : > { %1016 = vst [vmem:[%s1551_s7] sm:$0xff] %v1015_v46   ;;  %v573_v62 = vmul.f32 %v1528_v26, %v492_v54  ;;  %v581_v63 = vmul.f32 %v1528_v26, %v512_v55 }
  0xd7   : > { %1095 = vst [vmem:[%s1551_s7 + $0x20] sm:$0xff] %v1035_v47   ;;  %v624_v56 = vadd.f32 %v1534_v28, %v588_v52  ;;  %v632_v57 = vadd.f32 %v1534_v28, %v596_v53 }
  0xd8   : > { %v609_v6 = vadd.f32 %v1534_v28, %v573_v62  ;;  %v617_v7 = vadd.f32 %v1534_v28, %v581_v63 }
  0xd9   : > { %v656_v60 = vmax.f32 %v624_v56, 0.0  ;;  %v664_v61 = vmax.f32 %v632_v57, 0.0 }
  0xda   : > { %v641_v14 = vmax.f32 %v609_v6, 0.0  ;;  %v649_v15 = vmax.f32 %v617_v7, 0.0 }
  0xdb   : > { %v1055_v0 = vpack.c.bf16 %v656_v60, %v655_v58  ;;  %v1075_v1 = vpack.c.bf16 %v664_v61, %v663_v59 }
  0xdc   : > { %v532_v2 = vpop.f32.mrf.mxu2  ;;  %v552_v3 = vpop.f32.mrf.mxu3 }
  0xdd   : > { %1099 = vst [vmem:[%s1551_s7 + $0x40] sm:$0xff] %v1055_v0   ;;  %v494_v4 = vpop.f32.mrf.mxu0  ;;  %v514_v5 = vpop.f32.mrf.mxu1  ;;  %v589_v12 = vmul.f32 %v1528_v26, %v532_v2  ;;  %v597_v13 = vmul.f32 %v1528_v26, %v552_v3 }
  0xde   : > { %1103 = vst [vmem:[%s1551_s7 + $0x60] sm:$0xff] %v1075_v1   ;;  %v574_v8 = vmul.f32 %v1528_v26, %v494_v4  ;;  %v582_v9 = vmul.f32 %v1528_v26, %v514_v5 }
  0xdf   : > { %v625_v22 = vadd.f32 %v1534_v28, %v589_v12  ;;  %v633_v23 = vadd.f32 %v1534_v28, %v597_v13 }
  0xe0   : > { %v610_v10 = vadd.f32 %v1534_v28, %v574_v8  ;;  %v618_v11 = vadd.f32 %v1534_v28, %v582_v9 }
  0xe1   : > { %v657_v32 = vmax.f32 %v625_v22, 0.0  ;;  %v665_v33 = vmax.f32 %v633_v23, 0.0 }
  0xe2   : > { %v642_v16 = vmax.f32 %v610_v10, 0.0  ;;  %v650_v17 = vmax.f32 %v618_v11, 0.0 }
  0xe4   : > { %v1020_v18 = vpack.c.bf16 %v642_v16, %v641_v14  ;;  %v1040_v19 = vpack.c.bf16 %v650_v17, %v649_v15  ;;  %v534_v20 = vpop.f32.mrf.mxu2  ;;  %v554_v21 = vpop.f32.mrf.mxu3 }
  0xe5   : > { %v590_v24 = vmul.f32 %v1528_v26, %v534_v20  ;;  %v598_v25 = vmul.f32 %v1528_v26, %v554_v21  ;;  %v497_v27 = vpop.f32.mrf.mxu0  ;;  %v517_v29 = vpop.f32.mrf.mxu1 }
  0xe6   : > { %1092 = vst [vmem:[%s1551_s7 + $0x8] sm:$0xff] %v1020_v18   ;;  %v575_v36 = vmul.f32 %v1528_v26, %v497_v27  ;;  %v583_v37 = vmul.f32 %v1528_v26, %v517_v29 }
  0xe7   : > { %1096 = vst [vmem:[%s1551_s7 + $0x28] sm:$0xff] %v1040_v19   ;;  %v626_v30 = vadd.f32 %v1534_v28, %v590_v24  ;;  %v634_v31 = vadd.f32 %v1534_v28, %v598_v25 }
  0xe8   : > { %v611_v44 = vadd.f32 %v1534_v28, %v575_v36  ;;  %v619_v45 = vadd.f32 %v1534_v28, %v583_v37 }
  0xe9   : > { %v658_v34 = vmax.f32 %v626_v30, 0.0  ;;  %v666_v35 = vmax.f32 %v634_v31, 0.0 }
  0xea   : > { %v643_v52 = vmax.f32 %v611_v44, 0.0  ;;  %v651_v53 = vmax.f32 %v619_v45, 0.0 }
  0xeb   : > { %v1060_v38 = vpack.c.bf16 %v658_v34, %v657_v32  ;;  %v1080_v39 = vpack.c.bf16 %v666_v35, %v665_v33 }
  0xec   : > { %v537_v40 = vpop.f32.mrf.mxu2  ;;  %v557_v41 = vpop.f32.mrf.mxu3 }
  0xed   : > { %1100 = vst [vmem:[%s1551_s7 + $0x48] sm:$0xff] %v1060_v38   ;;  %v499_v42 = vpop.f32.mrf.mxu0  ;;  %v519_v43 = vpop.f32.mrf.mxu1  ;;  %v591_v50 = vmul.f32 %v1528_v26, %v537_v40  ;;  %v599_v51 = vmul.f32 %v1528_v26, %v557_v41 }
  0xee   : > { %1104 = vst [vmem:[%s1551_s7 + $0x68] sm:$0xff] %v1080_v39   ;;  %v576_v46 = vmul.f32 %v1528_v26, %v499_v42  ;;  %v584_v47 = vmul.f32 %v1528_v26, %v519_v43 }
  0xef   : > { %v627_v60 = vadd.f32 %v1534_v28, %v591_v50  ;;  %v635_v61 = vadd.f32 %v1534_v28, %v599_v51 }
  0xf0   : > { %v612_v48 = vadd.f32 %v1534_v28, %v576_v46  ;;  %v620_v49 = vadd.f32 %v1534_v28, %v584_v47 }
  0xf1   : > { %v659_v4 = vmax.f32 %v627_v60, 0.0  ;;  %v667_v5 = vmax.f32 %v635_v61, 0.0 }
  0xf2   : > { %v644_v54 = vmax.f32 %v612_v48, 0.0  ;;  %v652_v55 = vmax.f32 %v620_v49, 0.0 }
  0xf4   : > { %v1025_v56 = vpack.c.bf16 %v644_v54, %v643_v52  ;;  %v1045_v57 = vpack.c.bf16 %v652_v55, %v651_v53  ;;  %v539_v58 = vpop.f32.mrf.mxu2  ;;  %v559_v59 = vpop.f32.mrf.mxu3 }
  0xf5   : > { %v592_v62 = vmul.f32 %v1528_v26, %v539_v58  ;;  %v600_v63 = vmul.f32 %v1528_v26, %v559_v59  ;;  %v502_v0 = vpop.f32.mrf.mxu0  ;;  %v522_v1 = vpop.f32.mrf.mxu1 }
  0xf6   : > { %1093 = vst [vmem:[%s1551_s7 + $0x10] sm:$0xff] %v1025_v56   ;;  %v577_v8 = vmul.f32 %v1528_v26, %v502_v0  ;;  %v585_v9 = vmul.f32 %v1528_v26, %v522_v1 }
  0xf7   : > { %1097 = vst [vmem:[%s1551_s7 + $0x30] sm:$0xff] %v1045_v57   ;;  %v628_v2 = vadd.f32 %v1534_v28, %v592_v62  ;;  %v636_v3 = vadd.f32 %v1534_v28, %v600_v63 }
  0xf8   : > { %v613_v16 = vadd.f32 %v1534_v28, %v577_v8  ;;  %v621_v17 = vadd.f32 %v1534_v28, %v585_v9 }
  0xf9   : > { %v660_v6 = vmax.f32 %v628_v2, 0.0  ;;  %v668_v7 = vmax.f32 %v636_v3, 0.0 }
  0xfa   : > { %v645_v24 = vmax.f32 %v613_v16, 0.0  ;;  %v653_v25 = vmax.f32 %v621_v17, 0.0 }
  0xfb   : > { %v1065_v10 = vpack.c.bf16 %v660_v6, %v659_v4  ;;  %v1085_v11 = vpack.c.bf16 %v668_v7, %v667_v5 }
  0xfc   : > { %v542_v12 = vpop.f32.mrf.mxu2  ;;  %v562_v13 = vpop.f32.mrf.mxu3 }
  0xfd   : > { %1101 = vst [vmem:[%s1551_s7 + $0x50] sm:$0xff] %v1065_v10   ;;  %v504_v14 = vpop.f32.mrf.mxu0  ;;  %v524_v15 = vpop.f32.mrf.mxu1  ;;  %v593_v22 = vmul.f32 %v1528_v26, %v542_v12  ;;  %v601_v23 = vmul.f32 %v1528_v26, %v562_v13 }
  0xfe   : > { %1105 = vst [vmem:[%s1551_s7 + $0x70] sm:$0xff] %v1085_v11   ;;  %v578_v18 = vmul.f32 %v1528_v26, %v504_v14  ;;  %v586_v19 = vmul.f32 %v1528_v26, %v524_v15 }
  0xff   : > { %v629_v34 = vadd.f32 %v1534_v28, %v593_v22  ;;  %v637_v35 = vadd.f32 %v1534_v28, %v601_v23 }
 0x100   : > { %v614_v20 = vadd.f32 %v1534_v28, %v578_v18  ;;  %v622_v21 = vadd.f32 %v1534_v28, %v586_v19 }
 0x101   : > { %v661_v40 = vmax.f32 %v629_v34, 0.0  ;;  %v669_v41 = vmax.f32 %v637_v35, 0.0 }
 0x102   : > { %v646_v27 = vmax.f32 %v614_v20, 0.0  ;;  %v654_v29 = vmax.f32 %v622_v21, 0.0 }
 0x104   : > { %v1030_v30 = vpack.c.bf16 %v646_v27, %v645_v24  ;;  %v1050_v31 = vpack.c.bf16 %v654_v29, %v653_v25  ;;  %v544_v32 = vpop.f32.mrf.mxu2  ;;  %v564_v33 = vpop.f32.mrf.mxu3 }
 0x105   : > { %v594_v36 = vmul.f32 %v1528_v26, %v544_v32  ;;  %v602_v37 = vmul.f32 %v1528_v26, %v564_v33 }
 0x106   : > { %1094 = vst [vmem:[%s1551_s7 + $0x18] sm:$0xff] %v1030_v30  }
 0x107   : > { %1098 = vst [vmem:[%s1551_s7 + $0x38] sm:$0xff] %v1050_v31   ;;  %v630_v38 = vadd.f32 %v1534_v28, %v594_v36  ;;  %v638_v39 = vadd.f32 %v1534_v28, %v602_v37 }
 0x109   : > { %v662_v42 = vmax.f32 %v630_v38, 0.0  ;;  %v670_v26 = vmax.f32 %v638_v39, 0.0 }
 0x10b   : > { %v1070_v43 = vpack.c.bf16 %v662_v42, %v661_v40  ;;  %v1090_v44 = vpack.c.bf16 %v670_v26, %v669_v41 }
 0x10d   : > { %1102 = vst [vmem:[%s1551_s7 + $0x58] sm:$0xff] %v1070_v43  }
 0x10e   : > { %1106 = vst [vmem:[%s1551_s7 + $0x78] sm:$0xff] %v1090_v44  }
 0x10f   : > { %1297 = shalt.err (!%p1294_p0)
}
 0x110   : > { %s1361_s10 = smov 64   ;;  %s1362_s23 = smov 4  }
 0x111   : > { %1137 = dma.vmem_to_hbm [thread:$0]  (%p1470_p5), %s750_s18, 2048, %s752_s28, %s736_s29, %s1361_s10, %s1361_s10, %s1362_s23  }
 0x112 PF: > { %s766_s25 = sand.u32 1, %s1336_s15   ;;  %p1148_p3 = pnand %p877_p11, %p1437_p6 }
 0x113   : > { %s767_s30 = scalar_lea.sflag [#allocation4], %s766_s25 }
 0x114   : > { %p1149_p7 = pneg %p1148_p3 }
 0x116   : > { %1331 = dma.done.wait (%p1149_p7), %s767_s30, 2048  }
 0x117   : > { %1333 = vsyncadd (%p1149_p7), %s767_s30, 4294965248  ;;  %s21_s20 = sadd.s32 1, %s1356_s20   ;;  %s1678_s12 = sld [smem:[#allocation11_spill]] }
 0x118   : > { %p18_p9 = scmp.ge.s32.totalorder %s21_s20, 4   ;;  %s1679_s15 = smov %s1340_s16 }
 0x119   : > { %s1680_s16 = smov %s1344_s17  ;;  %s1681_s17 = smov %s1479_s22 }
 0x11a   : > { %s1682_s18 = smov %s1352_s19  ;;  %20 = sbr.rel (!%p18_p9) target bundleno = 9 (0x9), region = 92 }
 0x11d   : > { %s1683_s19 = smov %s1678_s12 }
 0x11f   :  { %773 = vsyncpa [#allocation3], 1 }
 0x120   :  { %775 = vsyncpa [#allocation3 + $0x1], 1 }
 0x121   :  { %776 = vsyncpa [#allocation6], 1 }
 0x122   :  { %777 = vsyncpa [#allocation4], 1 }
 0x123   :  { %779 = vsyncpa [#allocation4 + $0x1], 1 }

</bundles_post_ra>
